<compile_context>
chip_gen: v5e
topology: v5e:2x2
jax: 0.10.0
libtpu: 0.0.40
codegen_flags: <defaults>
</compile_context>

<pallas_src>
import jax
import jax.numpy as jnp
from jax.experimental import pallas as pl
from jax.experimental.pallas import tpu as pltpu

NEG_SLOPE = 0.005  # LeakyReLU(0.005)


def _round_up(n, m):
    return ((n + m - 1) // m) * m


def _cdiv(a, b):
    return (a + b - 1) // b


def mlp_kernel(task_ref, ctrl_ref, w1t_ref, w1c_ref, b1_ref, w2_ref, b2_ref,
               out_ref):
    # fc1 on the un-concatenated inputs:
    #   [tb, d_task] @ [d_task, H]  +  [tb, d_ctrl] @ [d_ctrl, H]  +  [1, H]
    h = (jnp.dot(task_ref[...], w1t_ref[...], preferred_element_type=jnp.float32)
         + jnp.dot(ctrl_ref[...], w1c_ref[...], preferred_element_type=jnp.float32)
         + b1_ref[...])
    # LeakyReLU(negative_slope=0.005)
    h = jnp.where(h > 0, h, NEG_SLOPE * h)
    # fc2: [tb, H] @ [H, out_dim] + [1, out_dim]  (out_dim = full array dim)
    out_ref[...] = (jnp.dot(h, w2_ref[...], preferred_element_type=jnp.float32)
                    + b2_ref[...]).astype(out_ref.dtype)


def mlp_forward(task, ctrl, w1, b1, w2, b2, *, tile_b=4096, use_pallas=None):
    """task: [B, d_task], ctrl: [B, d_ctrl]; w1: [in, H], w2: [H, H//2] ([in, out] layout)."""
    B, d_task = task.shape
    _, d_ctrl = ctrl.shape
    input_size, hidden = w1.shape
    assert d_task + d_ctrl == input_size
    out_dim = w2.shape[1]

    b1_2d = b1.reshape(1, hidden)
    b2_2d = b2.reshape(1, out_dim)

    if use_pallas is None:
        # Tiny batches: fused XLA is at least as fast as a kernel launch plus
        # the wrapper pad/slice passes; the kernel pays off when streaming.
        use_pallas = B >= 4096
    if not use_pallas:
        x = jnp.concatenate([task, ctrl], axis=-1)
        h = x @ w1 + b1_2d
        h = jnp.where(h > 0, h, NEG_SLOPE * h)
        return h @ w2 + b2_2d

    # Split w1 once in the wrapper (tiny) so the kernel never needs a concat.
    w1_task = w1[:d_task, :]
    w1_ctrl = w1[d_task:, :]

    # Tile selection: keep row padding minimal (tb ~= ceil(B / n_tiles)) and
    # guarantee >= 2 grid steps when B >= 16 so v7x can use both TensorCores.
    n_tiles = max(_cdiv(B, tile_b), 2 if B >= 16 else 1)
    tb = _round_up(_cdiv(B, n_tiles), 8)
    B_pad = _round_up(B, tb)
    if B_pad != B:
        task = jnp.pad(task, ((0, B_pad - B), (0, 0)))
        ctrl = jnp.pad(ctrl, ((0, B_pad - B), (0, 0)))

    grid = (B_pad // tb,)
    out = pl.pallas_call(
        mlp_kernel,
        out_shape=jax.ShapeDtypeStruct((B_pad, out_dim), task.dtype),
        grid_spec=pltpu.PrefetchScalarGridSpec(
            num_scalar_prefetch=0,
            grid=grid,
            in_specs=[
                pl.BlockSpec((tb, d_task), lambda i: (i, 0)),        # streamed
                pl.BlockSpec((tb, d_ctrl), lambda i: (i, 0)),        # streamed
                pl.BlockSpec((d_task, hidden), lambda i: (0, 0)),    # resident
                pl.BlockSpec((d_ctrl, hidden), lambda i: (0, 0)),    # resident
                pl.BlockSpec((1, hidden), lambda i: (0, 0)),         # resident
                pl.BlockSpec((hidden, out_dim), lambda i: (0, 0)),   # resident
                pl.BlockSpec((1, out_dim), lambda i: (0, 0)),        # resident
            ],
            out_specs=pl.BlockSpec((tb, out_dim), lambda i: (i, 0)),
        ),
        compiler_params=pltpu.CompilerParams(
            dimension_semantics=("parallel",)),
    )(task, ctrl, w1_task, w1_ctrl, b1_2d, w2, b2_2d)
    return out[:B] if B_pad != B else out


def init_params(key, input_size, hidden_size, output_size):
    """Deterministic synthetic params (PyTorch Linear shapes, stored as [in, out])."""
    ks = jax.random.split(key, 4)
    scale1 = 1.0 / jnp.sqrt(input_size)
    scale2 = 1.0 / jnp.sqrt(hidden_size)
    w1 = jax.random.uniform(ks[0], (input_size, hidden_size), jnp.float32, -scale1, scale1)
    b1 = jax.random.uniform(ks[1], (hidden_size,), jnp.float32, -scale1, scale1)
    w2 = jax.random.uniform(ks[2], (hidden_size, hidden_size // 2), jnp.float32, -scale2, scale2)
    b2 = jax.random.uniform(ks[3], (hidden_size // 2,), jnp.float32, -scale2, scale2)
    # TODO(synk): fc3/fc4 exist in __init__ but are unreachable in forward (early return) -> omitted.
    return w1, b1, w2, b2


if __name__ == "__main__":
    # Small shapes consistent with the module: input_size = d_task + d_ctrl
    B, d_task, d_ctrl = 16, 8, 8
    input_size = d_task + d_ctrl           # 16
    hidden_size = 32
    output_size = 8                        # unused (fc4 is dead code)

    key = jax.random.PRNGKey(0)
    k_task, k_ctrl, k_params = jax.random.split(key, 3)
    task = jax.random.normal(k_task, (B, d_task), jnp.float32)
    ctrl = jax.random.normal(k_ctrl, (B, d_ctrl), jnp.float32)
    w1, b1, w2, b2 = init_params(k_params, input_size, hidden_size, output_size)

    # Force the Pallas path so the kernel itself is exercised at this tiny B.
    out = mlp_forward(task, ctrl, w1, b1, w2, b2, use_pallas=True)
    out = jax.block_until_ready(out)

    # Pure-JAX reference check
    x = jnp.concatenate([task, ctrl], axis=-1)
    h = x @ w1 + b1
    h = jnp.where(h > 0, h, NEG_SLOPE * h)
    ref = h @ w2 + b2
    assert out.shape == (B, hidden_size // 2), out.shape
    assert jnp.allclose(out, ref, atol=1e-5, rtol=1e-5), float(jnp.max(jnp.abs(out - ref)))

    print("KERNEL_OK")
</pallas_src>

<mosaic_0001>
module attributes {stable_mosaic.version = 11 : i64} {
  func.func @mlp_kernel(%arg0: i32, %arg1: memref<8x8xf32, #tpu.memory_space<vmem>>, %arg2: memref<8x8xf32, #tpu.memory_space<vmem>>, %arg3: memref<8x32xf32, #tpu.memory_space<vmem>>, %arg4: memref<8x32xf32, #tpu.memory_space<vmem>>, %arg5: memref<1x32xf32, #tpu.memory_space<vmem>>, %arg6: memref<32x16xf32, #tpu.memory_space<vmem>>, %arg7: memref<1x16xf32, #tpu.memory_space<vmem>>, %arg8: memref<8x16xf32, #tpu.memory_space<vmem>>) attributes {dimension_semantics = [#tpu.dimension_semantics<parallel>], iteration_bounds = array<i64: 2>, scalar_prefetch = 0 : i64, scratch_operands = 0 : i64, tpu.core_type = #tpu.core_type<tc>, window_params = [{transform_indices = @transform_0, window_bounds = array<i64: 8, 8>}, {transform_indices = @transform_1, window_bounds = array<i64: 8, 8>}, {pipeline_mode = #tpu.pipeline_mode<synchronous>, transform_indices = @transform_2, window_bounds = array<i64: 8, 32>}, {pipeline_mode = #tpu.pipeline_mode<synchronous>, transform_indices = @transform_3, window_bounds = array<i64: 8, 32>}, {pipeline_mode = #tpu.pipeline_mode<synchronous>, transform_indices = @transform_4, window_bounds = array<i64: 1, 32>}, {pipeline_mode = #tpu.pipeline_mode<synchronous>, transform_indices = @transform_5, window_bounds = array<i64: 32, 16>}, {pipeline_mode = #tpu.pipeline_mode<synchronous>, transform_indices = @transform_6, window_bounds = array<i64: 1, 16>}, {transform_indices = @transform_7, window_bounds = array<i64: 8, 16>}]} {
    %c0 = arith.constant 0 : index
    %c0_0 = arith.constant 0 : index
    %0 = vector.load %arg1[%c0, %c0_0] : memref<8x8xf32, #tpu.memory_space<vmem>>, vector<8x8xf32>
    %c0_1 = arith.constant 0 : index
    %c0_2 = arith.constant 0 : index
    %1 = vector.load %arg3[%c0_1, %c0_2] : memref<8x32xf32, #tpu.memory_space<vmem>>, vector<8x32xf32>
    %cst = arith.constant dense<0.000000e+00> : vector<8x32xf32>
    %2 = tpu.matmul %0, %1, %cst {dimension_numbers = #tpu.dot_dimension_numbers<[1], [0], [0], [1], [0, 0, 1, 1], [], []>} : vector<8x8xf32>, vector<8x32xf32>, vector<8x32xf32> -> vector<8x32xf32>
    %c0_3 = arith.constant 0 : index
    %c0_4 = arith.constant 0 : index
    %3 = vector.load %arg2[%c0_3, %c0_4] : memref<8x8xf32, #tpu.memory_space<vmem>>, vector<8x8xf32>
    %c0_5 = arith.constant 0 : index
    %c0_6 = arith.constant 0 : index
    %4 = vector.load %arg4[%c0_5, %c0_6] : memref<8x32xf32, #tpu.memory_space<vmem>>, vector<8x32xf32>
    %cst_7 = arith.constant dense<0.000000e+00> : vector<8x32xf32>
    %5 = tpu.matmul %3, %4, %cst_7 {dimension_numbers = #tpu.dot_dimension_numbers<[1], [0], [0], [1], [0, 0, 1, 1], [], []>} : vector<8x8xf32>, vector<8x32xf32>, vector<8x32xf32> -> vector<8x32xf32>
    %6 = arith.addf %2, %5 : vector<8x32xf32>
    %c0_8 = arith.constant 0 : index
    %c0_9 = arith.constant 0 : index
    %7 = vector.load %arg5[%c0_8, %c0_9] : memref<1x32xf32, #tpu.memory_space<vmem>>, vector<1x32xf32>
    %8 = vector.broadcast %7 : vector<1x32xf32> to vector<8x32xf32>
    %9 = arith.addf %6, %8 : vector<8x32xf32>
    %cst_10 = arith.constant 0.000000e+00 : f32
    %10 = vector.broadcast %cst_10 : f32 to vector<8x32xf32>
    %11 = arith.cmpf ogt, %9, %10 : vector<8x32xf32>
    %cst_11 = arith.constant 5.000000e-03 : f32
    %12 = vector.broadcast %cst_11 : f32 to vector<8x32xf32>
    %13 = arith.mulf %12, %9 : vector<8x32xf32>
    %14 = arith.select %11, %9, %13 : vector<8x32xi1>, vector<8x32xf32>
    %c0_12 = arith.constant 0 : index
    %c0_13 = arith.constant 0 : index
    %15 = vector.load %arg6[%c0_12, %c0_13] : memref<32x16xf32, #tpu.memory_space<vmem>>, vector<32x16xf32>
    %cst_14 = arith.constant dense<0.000000e+00> : vector<8x16xf32>
    %16 = tpu.matmul %14, %15, %cst_14 {dimension_numbers = #tpu.dot_dimension_numbers<[1], [0], [0], [1], [0, 0, 1, 1], [], []>} : vector<8x32xf32>, vector<32x16xf32>, vector<8x16xf32> -> vector<8x16xf32>
    %c0_15 = arith.constant 0 : index
    %c0_16 = arith.constant 0 : index
    %17 = vector.load %arg7[%c0_15, %c0_16] : memref<1x16xf32, #tpu.memory_space<vmem>>, vector<1x16xf32>
    %18 = vector.broadcast %17 : vector<1x16xf32> to vector<8x16xf32>
    %19 = arith.addf %16, %18 : vector<8x16xf32>
    %c0_17 = arith.constant 0 : index
    %c0_18 = arith.constant 0 : index
    %20 = vector.load %arg8[%c0_17, %c0_18] : memref<8x16xf32, #tpu.memory_space<vmem>>, vector<8x16xf32>
    tpu.vector_store %arg8[%c0_17, %c0_18], %19 {strides = array<i32>} : memref<8x16xf32, #tpu.memory_space<vmem>>, vector<8x16xf32>,
    return
  }
  func.func @transform_0(%arg0: i32) -> (i32, i32) {
    %c0_i32 = arith.constant 0 : i32
    %c0_i32_0 = arith.constant 0 : i32
    return %arg0, %c0_i32 : i32, i32
  }
  func.func @transform_1(%arg0: i32) -> (i32, i32) {
    %c0_i32 = arith.constant 0 : i32
    %c0_i32_0 = arith.constant 0 : i32
    return %arg0, %c0_i32 : i32, i32
  }
  func.func @transform_2(%arg0: i32) -> (i32, i32) {
    %c0_i32 = arith.constant 0 : i32
    %c0_i32_0 = arith.constant 0 : i32
    %c0_i32_1 = arith.constant 0 : i32
    return %c0_i32, %c0_i32_0 : i32, i32
  }
  func.func @transform_3(%arg0: i32) -> (i32, i32) {
    %c0_i32 = arith.constant 0 : i32
    %c0_i32_0 = arith.constant 0 : i32
    %c0_i32_1 = arith.constant 0 : i32
    return %c0_i32, %c0_i32_0 : i32, i32
  }
  func.func @transform_4(%arg0: i32) -> (i32, i32) {
    %c0_i32 = arith.constant 0 : i32
    %c0_i32_0 = arith.constant 0 : i32
    %c0_i32_1 = arith.constant 0 : i32
    return %c0_i32, %c0_i32_0 : i32, i32
  }
  func.func @transform_5(%arg0: i32) -> (i32, i32) {
    %c0_i32 = arith.constant 0 : i32
    %c0_i32_0 = arith.constant 0 : i32
    %c0_i32_1 = arith.constant 0 : i32
    return %c0_i32, %c0_i32_0 : i32, i32
  }
  func.func @transform_6(%arg0: i32) -> (i32, i32) {
    %c0_i32 = arith.constant 0 : i32
    %c0_i32_0 = arith.constant 0 : i32
    %c0_i32_1 = arith.constant 0 : i32
    return %c0_i32, %c0_i32_0 : i32, i32
  }
  func.func @transform_7(%arg0: i32) -> (i32, i32) {
    %c0_i32 = arith.constant 0 : i32
    %c0_i32_0 = arith.constant 0 : i32
    return %arg0, %c0_i32 : i32, i32
  }
}

</mosaic_0001>

<bundles_post_ra>
// kernel: tpu_custom_call.1
= control target key start
LH: loop header
LB: loop body
LE: loop exit
PB: predicated region body
PF: predicated region fallthrough
CT: control target
= control target key end

     0   :  { %12 = vsyncpa [#allocation3], 0  ;;  %s742_s0 = inlined_call_operand.vmem [shape: f32[16,8], index: 0, kind: input, shape index: {}]   ;;  %s743_s1 = inlined_call_operand.vmem [shape: f32[16,8], index: 1, kind: input, shape index: {}]   ;;  %s744_s2 = inlined_call_operand.vmem [shape: f32[8,32], index: 2, kind: input, shape index: {}]   ;;  %s745_s3 = inlined_call_operand.vmem [shape: f32[8,32], index: 3, kind: input, shape index: {}]   ;;  %s746_s4 = inlined_call_operand.vmem [shape: f32[1,32], index: 4, kind: input, shape index: {}]   ;;  %s747_s5 = inlined_call_operand.vmem [shape: f32[32,16], index: 5, kind: input, shape index: {}]   ;;  %s748_s6 = inlined_call_operand.vmem [shape: f32[1,16], index: 6, kind: input, shape index: {}]   ;;  %s749_s7 = inlined_call_operand.hbm [shape: f32[16,16], index: 7, kind: output, shape index: {}]  }
   0x1   :  { %14 = vsyncpa [#allocation3 + $0x1], 0  ;;  %s630_s24 = smov 0   ;;  %s632_s25 = smov 0  }
   0x2   :  { %s634_s26 = smov 0   ;;  %s636_s27 = smov 0  }
   0x3 LB: > { %s651_s28 = sadd.s32 4294967295, %s588_s27   ;;  %s471_s29 = sadd.s32 4294967294, %s588_s27   ;;  %s588_s27 = sphi %s636_s27, %s755_s27   ;;  %s584_s26 = sphi %s634_s26, %s754_s26   ;;  %s580_s25 = sphi %s632_s25, %s753_s25   ;;  %s576_s24 = sphi %s630_s24, %s752_s24  }
   0x4   : > { %s655_s30 = sadd.s32 1, %s588_s27   ;;  %s184_s8 = sadd.s32 1, %s584_s26 }
   0x5   : > { %s181_s9 = ssub.s32 %s588_s27, %s655_s30  ;;  %p194_p0 = scmp.ne.s32.totalorder %s584_s26, %s580_s25 }
   0x6   : > { %p182_p1 = scmp.eq.s32.totalorder %s181_s9, 0  ;;  %p195_p2 = scmp.eq.s32.totalorder %s651_s28, 1 }
   0x7   : > { %p200_p3 = scmp.ne.s32.totalorder %s580_s25, %s576_s24  ;;  %p201_p4 = scmp.eq.s32.totalorder %s471_s29, 1 }
   0x8   : > { %s666_s10 = scalar_select %p182_p1, %s584_s26, %s184_s8  }
   0x9   : > { %p668_p5 = por %p195_p2, %p194_p0  ;;  %p672_p6 = por %p201_p4, %p200_p3 }
   0xa   : > { %p474_p7 = scmp.ge.s32.totalorder %s588_s27, 1  ;;  %p248_p8 = scmp.lt.s32.totalorder %s588_s27, 3 }
   0xc   : > { %p249_p9 = pnand %p474_p7, %p248_p8 }
   0xd   : > { %p283_p10 = scmp.lt.s32.totalorder (!%p249_p9), %s651_s28, 1  ;;  %s482_s23 = sshll.u32 (!%p249_p9), %s651_s28, 3 }
   0xe   : > { %252 = sbr.rel (%p249_p9) target bundleno = 295 (0x127), region = 48  ;;  %s395_s9 = scalar_lea.hbm (!%p249_p9), %s749_s7, %s482_s23 }
  0x13   : > { %v294_v0 = vld [vmem:[%s745_s3] sm:$0xff]  ;;  %s284_s17 = scalar_select %p283_p10, %s651_s28, 1  ;;  %vm295_vm0 = vcmask 64512   ;;  %v353_v4 = vld [vmem:[%s747_s5 + $0x18] sm:$0xff]  ;;  %v352_v5 = vld [vmem:[%s747_s5 + $0x10] sm:$0xff]  ;;  %vm358_vm2 = vcmask 261120  }
  0x14   : > { %v292_v1 = vld [vmem:[%s744_s2] sm:$0xff]  ;;  %314 = vmatpush.msra.mxu0 %v294_v0  ;;  %374 = vmatpush.msra.mxu2 %v353_v4  ;;  %v351_v6 = vld [vmem:[%s747_s5 + $0x8] sm:$0xff]  ;;  %vm382_vm3 = vcmask 130048  }
  0x15   : > { %337 = vmatpush.msra.mxu1 %v292_v1  ;;  %s476_s18 = sshll.u32 %s284_s17, 3  ;;  %v350_v7 = vld [vmem:[%s747_s5] sm:$0xff]  ;;  %s399_s17 = sshll.u32 %s395_s9, 4  ;;  %s400_s17 = int_to_ptr.hbm [resolvable:$true] %s399_s17 }
  0x16   : > { %s290_s21 = scalar_lea.vmem %s743_s1, %s476_s18  ;;  %s286_s29 = scalar_lea.vmem %s742_s0, %s476_s18  ;;  %375 = vmatpush.msra.mxu2 %v352_v5  ;;  %v524_v8 = vld [vmem:[%s746_s4] ss:$0 sm:$0xff] }
  0x17   : > { %v293_v2 = vld [vmem:[%s290_s21] sm:$0xff]  ;;  %s280_s21 = sand.u32 1, %s580_s25   ;;  %s540_s28 = sshra.s32 %s400_s17, 4  ;;  %s541_s28 = int_to_ptr.hbm [resolvable:$true] %s540_s28 }
  0x18   : > { %v291_v3 = vld [vmem:[%s286_s29] sm:$0xff]  ;;  %478 = vmatmul.msk.f32.vlgmr.msra.gmra.mxu0 %vm295_vm0, %v293_v2  ;;  %376 = vmatpush.msra.mxu2 %v351_v6  ;;  %s475_s22 = sshll.u32 %s280_s21, 3  ;;  %s385_s18 = scalar_lea.sflag [#allocation3], %s280_s21 }
  0x19   : > { %479 = vmatmul.msk.f32.vlgmr.msra.gmra.mxu1 %vm295_vm0, %v291_v3  ;;  %v525_v15 = vld [vmem:[%s748_s6] ss:$0 sm:$0xff]  ;;  %s282_s15 = scalar_lea.vmem [#allocation2], %s475_s22  ;;  %s542_s19 = scalar_lea.hbm %s541_s28, 8 }
  0x1a   : > { %377 = vmatpush.msra.mxu2 %v350_v7  ;;  %s397_s16 = sshll.u32 %s282_s15, 4  ;;  %p543_p11 = scmp.ne.s32.totalorder %s541_s28, %s542_s19  ;;  %s398_s16 = int_to_ptr.vmem [resolvable:$true] %s397_s16 }
  0x1b   : > { %s546_s22 = scalar_lea.hbm %s749_s7, 16  ;;  %p547_p0 = scmp.lt.s32.totalorder %s541_s28, %s749_s7 }
  0x1c   : > { %p544_p12 = pnand %p543_p11, %p668_p5  ;;  %p548_p1 = scmp.lt.s32.totalorder %s546_s22, %s542_s19 }
  0x1e   : > { %p545_p13 = pneg %p544_p12  ;;  %p549_p2 = por %p548_p1, %p547_p0 }
  0x20   : > { %p550_p3 = pnand %p549_p2, %p545_p13 }
  0x95   : > { %v316_v9 = vpop.f32.mrf.mxu0 }
  0x96   : > { %v339_v10 = vpop.f32.mrf.mxu1 }
  0x97   : > { %v340_v11 = vadd.f32 %v339_v10, %v316_v9 }
  0x99   : > { %v346_v12 = vadd.f32 %v524_v8, %v340_v11 }
  0x9b   : > { %vm347_vm1 = vcmp.gt.f32.partialorder %v346_v12, 0.0  ;;  %v348_v13 = vmul.f32 0.005, %v346_v12 }
  0x9d   : > { %v349_v14 = vsel %vm347_vm1, %v346_v12, %v348_v13 }
  0x9e   : > { %480 = vmatmul.msk.f32.vlgmr.msra.gmra.mxu2 %vm358_vm2, %v349_v14 }
 0x121   : > { %v379_v16 = vpop.f32.mrf.mxu2 }
 0x122   : > { %v380_v17 = vadd.f32 %v525_v15, %v379_v16 }
 0x124   : > { %383 = vst.msk [vmem:[%s282_s15] sm:$0xff] %vm382_vm3, %v380_v17 }
 0x125   : > { %553 = shalt.err (!%p550_p3)
}
 0x126   : > { %485 = dma.vmem_to_hbm [thread:$0]  (%p668_p5), %s398_s16, 128, %s400_s17, %s385_s18  }
 0x127 PF: > { %p491_p4 = scmp.ge.s32.totalorder %s588_s27, 2  ;;  %s411_s21 = sand.u32 1, %s576_s24  }
 0x128   : > { %s412_s9 = scalar_lea.sflag [#allocation3], %s411_s21 }
 0x129   : > { %p488_p7 = pnand %p491_p4, %p672_p6 }
 0x12b   : > { %p489_p8 = pneg %p488_p7 }
 0x12d   : > { %571 = dma.done.wait (%p489_p8), %s412_s9, 128  }
 0x12e   : > { %573 = vsyncadd (%p489_p8), %s412_s9, 4294967168  ;;  %p17_p9 = scmp.ge.s32.totalorder %s655_s30, 4   ;;  %s752_s24 = smov %s580_s25 }
 0x12f   : > { %s753_s25 = smov %s584_s26  ;;  %s754_s26 = smov %s666_s10 }
 0x130   : > { %s755_s27 = smov %s655_s30  ;;  %19 = sbr.rel (!%p17_p9) target bundleno = 3 (0x3), region = 86 }
 0x135   :  { %418 = vsyncpa [#allocation3], 1 }
 0x136   :  { %420 = vsyncpa [#allocation3 + $0x1], 1 }

</bundles_post_ra>
